<compile_context>
chip_gen: v5e
topology: v5e:2x2
jax: 0.10.0
libtpu: 0.0.40
codegen_flags: <defaults>
</compile_context>

<pallas_src>
import jax
import jax.numpy as jnp
from jax.experimental import pallas as pl
from jax.experimental.pallas import tpu as pltpu


# ----------------------------------------------------------------------------
# Pallas kernel: B images per grid step, everything 2-D and lane-dense.
# ----------------------------------------------------------------------------
def _aux_head_kernel(x_ref, wc_ref, bias_ref, mtop_ref, mbot_ref, wcomb_ref, rhb_ref, o_ref):
    # x_ref    : (B*H, W*C_in)      bf16  rows of B images, lane index = w*C_in + c
    # wc_ref   : (W*C_in, 3*NB)     bf16  width-banded 3x3 conv weights (BN scale folded),
    #                                     one NB-wide band per height tap dy in {0,1,2}
    # bias_ref : (1, NB)            f32   folded BatchNorm bias, tiled across W
    # mtop_ref : (B*H, 1)           f32   0.0 on the first row of each image, else 1.0
    # mbot_ref : (B*H, 1)           f32   0.0 on the last row of each image, else 1.0
    # wcomb_ref: (NB, WO*n_cls)     bf16  kron(Rw.T, w1): 1x1 conv fused with width resize
    # rhb_ref  : (B*HO, B*H)        bf16  kron(I_B, Rh): per-image height resize
    # o_ref    : (B*HO, WO*n_cls)   bf16  lane-dense output block
    BH = x_ref.shape[0]
    NB = bias_ref.shape[-1]

    x = x_ref[...]

    # --- 3x3 conv: one MXU matmul, the 3 dy taps stacked along N ---------------------------------
    r = jnp.dot(x, wc_ref[...], preferred_element_type=jnp.float32)      # (BH, 3*NB) f32
    b0 = r[:, 0 * NB:1 * NB]      # dy=0 tap -> needs input row y-1
    b1 = r[:, 1 * NB:2 * NB]      # dy=1 tap -> input row y
    b2 = r[:, 2 * NB:3 * NB]      # dy=2 tap -> input row y+1

    # Shift dy=0 / dy=2 contributions by one row with an XLU sublane roll; the precomputed masks
    # zero the rows that cross an image's top/bottom boundary (= height zero-padding), including
    # the roll wrap-around rows and cross-image boundaries when B > 1.
    down = pltpu.roll(b0, shift=1, axis=0) * mtop_ref[...]               # down[y] = b0[y-1]
    up = pltpu.roll(b2, shift=BH - 1, axis=0) * mbot_ref[...]            # up[y]   = b2[y+1]

    # --- folded BatchNorm bias + ReLU6 (f32 VPU; ~4 vregs, negligible) ----------------------------
    feat = jnp.clip(b1 + down + up + bias_ref[...], 0.0, 6.0)            # (BH, NB)
    # Dropout(p=0.1) is identity in eval/inference mode.
    # TODO(synk): training-mode dropout (mask via pltpu.prng_random_bits) not implemented.

    # --- 1x1 conv fused with the width bilinear resize: one lane-dense matmul --------------------
    z = jnp.dot(feat.astype(wcomb_ref.dtype), wcomb_ref[...],
                preferred_element_type=jnp.float32)                      # (BH, WO*n_cls)

    # --- height bilinear resize (block-diagonal over the B images of this step) ------------------
    out = jnp.dot(rhb_ref[...], z.astype(rhb_ref.dtype),
                  preferred_element_type=jnp.float32)                    # (B*HO, WO*n_cls)

    o_ref[...] = out.astype(o_ref.dtype)


# ----------------------------------------------------------------------------
# Glue: bilinear interpolation matrix matching PyTorch align_corners=False.
# ----------------------------------------------------------------------------
def _bilinear_matrix(in_size, out_size):
    scale = in_size / out_size
    dst = jnp.arange(out_size, dtype=jnp.float32)
    src = scale * (dst + 0.5) - 0.5
    src = jnp.maximum(src, 0.0)                       # PyTorch clamps negative src to 0
    i0 = jnp.clip(jnp.floor(src).astype(jnp.int32), 0, in_size - 1)
    i1 = jnp.minimum(i0 + 1, in_size - 1)
    lam1 = src - i0.astype(jnp.float32)
    lam0 = 1.0 - lam1
    rows = jnp.arange(out_size)
    R = jnp.zeros((out_size, in_size), jnp.float32)
    R = R.at[rows, i0].add(lam0)
    R = R.at[rows, i1].add(lam1)
    return R


def _tpu_kind():
    try:
        return jax.devices()[0].device_kind.lower()
    except Exception:
        return ""


# ----------------------------------------------------------------------------
# Wrapper (NCHW in/out, like the PyTorch module). All operator preprocessing
# (BN folding, band construction, kron fusions) happens here on tiny weights.
# ----------------------------------------------------------------------------
def aux_head_forward(x_nchw, params, h, w, *, images_per_step=None,
                     compute_dtype=jnp.bfloat16, out_dtype=jnp.bfloat16):
    N, C_in, H, W = x_nchw.shape
    w3 = params["w3"].astype(jnp.float32)           # (3, 3, C_in, C_mid)
    C_mid = w3.shape[-1]
    w1 = params["w1"].astype(jnp.float32)           # (C_mid, n_cls)
    n_cls = w1.shape[-1]

    # --- generation-aware images-per-step -------------------------------------------------------
    # Single TC (v5e/v6e): one grid step (B = N) -> best MXU fill, single per-step overhead.
    # Dual TC / megacore (v4/v5p/v7x): keep >= 2 "parallel" steps so both cores get work.
    if images_per_step is None:
        kind = _tpu_kind()
        dual_core = any(tag in kind for tag in ("v4", "v5p", "7"))
        target_steps = 2 if (dual_core and N >= 2) else 1
        steps = target_steps
        while N % steps != 0:
            steps += 1
        B = N // steps
    else:
        B = 1
        for cand in range(min(images_per_step, N), 0, -1):
            if N % cand == 0:
                B = cand
                break
        steps = N // B

    # Fold BatchNorm (inference stats): scale goes into the conv weights, bias stays a vector.
    eps = 1e-5
    scale = params["gamma"] / jnp.sqrt(params["var"] + eps)
    bias = params["beta"] - params["mean"] * scale
    w3s = w3 * scale[None, None, None, :]

    # Width-banded conv weights: output column block x pulls input blocks x-1, x, x+1
    # (out-of-range blocks dropped -> width zero-padding is free). One band per height tap dy.
    bands = []
    for dy in range(3):
        band = jnp.zeros((W * C_in, W * C_mid), jnp.float32)
        for dx in range(3):
            band = band + jnp.kron(jnp.eye(W, W, k=1 - dx, dtype=jnp.float32), w3s[dy, dx])
        bands.append(band)
    wc = jnp.concatenate(bands, axis=1).astype(compute_dtype)            # (W*C_in, 3*W*C_mid)

    bias_t = jnp.tile(bias, W).reshape(1, W * C_mid).astype(jnp.float32)  # lane = w*C_mid + c

    # Height-boundary masks for the rolled dy=0 / dy=2 taps (precomputed, per-row multipliers).
    rows = jnp.arange(B * H)
    mtop = (rows % H != 0).astype(jnp.float32).reshape(B * H, 1)
    mbot = (rows % H != H - 1).astype(jnp.float32).reshape(B * H, 1)

    # 1x1 conv fused with the width resize; block-diag height resize over the B images per step.
    Rh = _bilinear_matrix(H, h)                                          # (HO, H)
    Rw = _bilinear_matrix(W, w)                                          # (WO, W)
    wcomb = jnp.kron(Rw.T, w1).astype(compute_dtype)                     # (W*C_mid, WO*n_cls)
    rh_blk = jnp.kron(jnp.eye(B, dtype=jnp.float32), Rh).astype(compute_dtype)  # (B*HO, B*H)

    # NCHW -> rows=(N*H), lanes=(W*C_in). No spatial padding pass: padding is folded into wc
    # (width) and handled by the in-kernel roll+mask (height).
    x_rows = jnp.transpose(x_nchw, (0, 2, 3, 1)).reshape(N * H, W * C_in).astype(compute_dtype)

    NB = W * C_mid

    def _call(single_buffer_consts):
        const_kw = {"pipeline_mode": pl.Buffered(1)} if single_buffer_consts else {}
        in_specs = [
            pl.BlockSpec((B * H, W * C_in), lambda n: (n, 0)),
            pl.BlockSpec((W * C_in, 3 * NB), lambda n: (0, 0), **const_kw),
            pl.BlockSpec((1, NB), lambda n: (0, 0), **const_kw),
            pl.BlockSpec((B * H, 1), lambda n: (0, 0), **const_kw),
            pl.BlockSpec((B * H, 1), lambda n: (0, 0), **const_kw),
            pl.BlockSpec((NB, w * n_cls), lambda n: (0, 0), **const_kw),
            pl.BlockSpec((B * h, B * H), lambda n: (0, 0), **const_kw),
        ]
        return pl.pallas_call(
            _aux_head_kernel,
            out_shape=jax.ShapeDtypeStruct((N * h, w * n_cls), out_dtype),
            grid_spec=pltpu.PrefetchScalarGridSpec(
                num_scalar_prefetch=0,
                grid=(steps,),
                in_specs=in_specs,
                out_specs=pl.BlockSpec((B * h, w * n_cls), lambda n: (n, 0)),
            ),
            compiler_params=pltpu.CompilerParams(
                dimension_semantics=("parallel",)),
        )(x_rows, wc, bias_t, mtop, mbot, wcomb, rh_blk)

    try:
        # Single-buffer the grid-invariant operands (constant index_map) -> half the weight VMEM.
        out2d = _call(True)
    except Exception:
        # pipeline_mode=pl.Buffered(1) not supported on this jax version: default double-buffering.
        out2d = _call(False)

    # (N*HO, WO*n_cls) -> NCHW
    return jnp.transpose(out2d.reshape(N, h, w, n_cls), (0, 3, 1, 2))


# ----------------------------------------------------------------------------
# Pure-JAX f32 reference (same math, outside Pallas) for a sanity check.
# ----------------------------------------------------------------------------
def _reference(x_nchw, params, h, w):
    N, C_in, H, W = x_nchw.shape
    w3 = params["w3"]
    C_mid = w3.shape[-1]
    w1 = params["w1"]
    eps = 1e-5
    scale = params["gamma"] / jnp.sqrt(params["var"] + eps)
    bias = params["beta"] - params["mean"] * scale

    x_nhwc = jnp.transpose(x_nchw, (0, 2, 3, 1)).astype(jnp.float32)
    x_pad = jnp.pad(x_nhwc, ((0, 0), (1, 1), (1, 1), (0, 0)))
    acc = jnp.zeros((N, H, W, C_mid), jnp.float32)
    for dy in range(3):
        for dx in range(3):
            acc = acc + jnp.einsum('nhwc,co->nhwo',
                                   x_pad[:, dy:dy + H, dx:dx + W, :], w3[dy, dx])
    feat = jnp.clip(acc * scale + bias, 0.0, 6.0)
    logits = jnp.einsum('nhwc,co->nhwo', feat, w1)
    Rh = _bilinear_matrix(H, h)
    Rw = _bilinear_matrix(W, w)
    up = jnp.einsum('oi,niwc->nowc', Rh, logits)
    up = jnp.einsum('pj,nojc->nopc', Rw, up)
    return jnp.transpose(up, (0, 3, 1, 2))


if __name__ == "__main__":
    # Small shapes consistent with AuxHead(in_channels=16, num_classes=8).
    N, C_in, H, W = 4, 16, 8, 8
    n_cls = 8
    h_out, w_out = 16, 16

    key = jax.random.PRNGKey(0)
    kx, kw3, kw1, kg, kb, km, kv = jax.random.split(key, 7)

    x = jax.random.normal(kx, (N, C_in, H, W), jnp.float32)

    params = {
        "w3": 0.1 * jax.random.normal(kw3, (3, 3, C_in, C_in), jnp.float32),
        "w1": 0.1 * jax.random.normal(kw1, (C_in, n_cls), jnp.float32),
        "gamma": 1.0 + 0.05 * jax.random.normal(kg, (C_in,), jnp.float32),
        "beta": 0.05 * jax.random.normal(kb, (C_in,), jnp.float32),
        "mean": 0.05 * jax.random.normal(km, (C_in,), jnp.float32),
        "var": jnp.abs(1.0 + 0.05 * jax.random.normal(kv, (C_in,), jnp.float32)),
    }

    out = aux_head_forward(x, params, h_out, w_out)
    out = jax.block_until_ready(out)

    ref = _reference(x, params, h_out, w_out)
    assert out.shape == (N, n_cls, h_out, w_out)
    # bf16 matmul chain + bf16 output inside the kernel vs f32 reference -> loose tolerance.
    err = jnp.max(jnp.abs(out.astype(jnp.float32) - ref))
    assert jnp.allclose(out.astype(jnp.float32), ref, atol=7.5e-2, rtol=7.5e-2), \
        f"max abs err {err}"

    print("KERNEL_OK")
</pallas_src>

<mosaic_0001>
module attributes {stable_mosaic.version = 11 : i64} {
  func.func @_aux_head_kernel(%arg0: i32, %arg1: memref<32x128xbf16, #tpu.memory_space<vmem>>, %arg2: memref<128x384xbf16, #tpu.memory_space<vmem>>, %arg3: memref<1x128xf32, #tpu.memory_space<vmem>>, %arg4: memref<32x1xf32, #tpu.memory_space<vmem>>, %arg5: memref<32x1xf32, #tpu.memory_space<vmem>>, %arg6: memref<128x128xbf16, #tpu.memory_space<vmem>>, %arg7: memref<64x32xbf16, #tpu.memory_space<vmem>>, %arg8: memref<64x128xbf16, #tpu.memory_space<vmem>>) attributes {dimension_semantics = [#tpu.dimension_semantics<parallel>], iteration_bounds = array<i64: 1>, scalar_prefetch = 0 : i64, scratch_operands = 0 : i64, tpu.core_type = #tpu.core_type<tc>, window_params = [{transform_indices = @transform_0, window_bounds = array<i64: 32, 128>}, {pipeline_mode = #tpu.pipeline_mode<synchronous>, transform_indices = @transform_1, window_bounds = array<i64: 128, 384>}, {pipeline_mode = #tpu.pipeline_mode<synchronous>, transform_indices = @transform_2, window_bounds = array<i64: 1, 128>}, {pipeline_mode = #tpu.pipeline_mode<synchronous>, transform_indices = @transform_3, window_bounds = array<i64: 32, 1>}, {pipeline_mode = #tpu.pipeline_mode<synchronous>, transform_indices = @transform_4, window_bounds = array<i64: 32, 1>}, {pipeline_mode = #tpu.pipeline_mode<synchronous>, transform_indices = @transform_5, window_bounds = array<i64: 128, 128>}, {pipeline_mode = #tpu.pipeline_mode<synchronous>, transform_indices = @transform_6, window_bounds = array<i64: 64, 32>}, {transform_indices = @transform_7, window_bounds = array<i64: 64, 128>}]} {
    %c0 = arith.constant 0 : index
    %c0_0 = arith.constant 0 : index
    %0 = vector.load %arg1[%c0, %c0_0] : memref<32x128xbf16, #tpu.memory_space<vmem>>, vector<32x128xbf16>
    %c0_1 = arith.constant 0 : index
    %c0_2 = arith.constant 0 : index
    %1 = vector.load %arg2[%c0_1, %c0_2] : memref<128x384xbf16, #tpu.memory_space<vmem>>, vector<128x384xbf16>
    %cst = arith.constant dense<0.000000e+00> : vector<32x384xf32>
    %2 = tpu.matmul %0, %1, %cst {dimension_numbers = #tpu.dot_dimension_numbers<[1], [0], [0], [1], [0, 0, 1, 1], [], []>} : vector<32x128xbf16>, vector<128x384xbf16>, vector<32x384xf32> -> vector<32x384xf32>
    %3 = vector.extract_strided_slice %2 {offsets = [0, 0], sizes = [32, 128], strides = [1, 1]} : vector<32x384xf32> to vector<32x128xf32>
    %4 = vector.extract_strided_slice %2 {offsets = [0, 128], sizes = [32, 128], strides = [1, 1]} : vector<32x384xf32> to vector<32x128xf32>
    %5 = vector.extract_strided_slice %2 {offsets = [0, 256], sizes = [32, 128], strides = [1, 1]} : vector<32x384xf32> to vector<32x128xf32>
    %c1_i32 = arith.constant 1 : i32
    %6 = tpu.dynamic_rotate %3 by %c1_i32 dim 0 : vector<32x128xf32>, i32 -> vector<32x128xf32>
    %c0_3 = arith.constant 0 : index
    %c0_4 = arith.constant 0 : index
    %7 = vector.load %arg4[%c0_3, %c0_4] : memref<32x1xf32, #tpu.memory_space<vmem>>, vector<32x1xf32>
    %8 = vector.broadcast %7 : vector<32x1xf32> to vector<32x128xf32>
    %9 = arith.mulf %6, %8 : vector<32x128xf32>
    %c31_i32 = arith.constant 31 : i32
    %10 = tpu.dynamic_rotate %5 by %c31_i32 dim 0 : vector<32x128xf32>, i32 -> vector<32x128xf32>
    %c0_5 = arith.constant 0 : index
    %c0_6 = arith.constant 0 : index
    %11 = vector.load %arg5[%c0_5, %c0_6] : memref<32x1xf32, #tpu.memory_space<vmem>>, vector<32x1xf32>
    %12 = vector.broadcast %11 : vector<32x1xf32> to vector<32x128xf32>
    %13 = arith.mulf %10, %12 : vector<32x128xf32>
    %14 = arith.addf %4, %9 : vector<32x128xf32>
    %15 = arith.addf %14, %13 : vector<32x128xf32>
    %c0_7 = arith.constant 0 : index
    %c0_8 = arith.constant 0 : index
    %16 = vector.load %arg3[%c0_7, %c0_8] : memref<1x128xf32, #tpu.memory_space<vmem>>, vector<1x128xf32>
    %17 = vector.broadcast %16 : vector<1x128xf32> to vector<32x128xf32>
    %18 = arith.addf %15, %17 : vector<32x128xf32>
    %cst_9 = arith.constant 0.000000e+00 : f32
    %cst_10 = arith.constant 6.000000e+00 : f32
    %19 = vector.broadcast %cst_9 : f32 to vector<32x128xf32>
    %20 = arith.maximumf %19, %18 : vector<32x128xf32>
    %21 = vector.broadcast %cst_10 : f32 to vector<32x128xf32>
    %22 = arith.minimumf %21, %20 : vector<32x128xf32>
    %23 = arith.truncf %22 : vector<32x128xf32> to vector<32x128xbf16>
    %c0_11 = arith.constant 0 : index
    %c0_12 = arith.constant 0 : index
    %24 = vector.load %arg6[%c0_11, %c0_12] : memref<128x128xbf16, #tpu.memory_space<vmem>>, vector<128x128xbf16>
    %cst_13 = arith.constant dense<0.000000e+00> : vector<32x128xf32>
    %25 = tpu.matmul %23, %24, %cst_13 {dimension_numbers = #tpu.dot_dimension_numbers<[1], [0], [0], [1], [0, 0, 1, 1], [], []>} : vector<32x128xbf16>, vector<128x128xbf16>, vector<32x128xf32> -> vector<32x128xf32>
    %c0_14 = arith.constant 0 : index
    %c0_15 = arith.constant 0 : index
    %26 = vector.load %arg7[%c0_14, %c0_15] : memref<64x32xbf16, #tpu.memory_space<vmem>>, vector<64x32xbf16>
    %27 = arith.truncf %25 : vector<32x128xf32> to vector<32x128xbf16>
    %cst_16 = arith.constant dense<0.000000e+00> : vector<64x128xf32>
    %28 = tpu.matmul %26, %27, %cst_16 {dimension_numbers = #tpu.dot_dimension_numbers<[1], [0], [0], [1], [0, 0, 1, 1], [], []>} : vector<64x32xbf16>, vector<32x128xbf16>, vector<64x128xf32> -> vector<64x128xf32>
    %29 = arith.truncf %28 : vector<64x128xf32> to vector<64x128xbf16>
    %c0_17 = arith.constant 0 : index
    %c0_18 = arith.constant 0 : index
    %30 = vector.load %arg8[%c0_17, %c0_18] : memref<64x128xbf16, #tpu.memory_space<vmem>>, vector<64x128xbf16>
    tpu.vector_store %arg8[%c0_17, %c0_18], %29 {strides = array<i32>} : memref<64x128xbf16, #tpu.memory_space<vmem>>, vector<64x128xbf16>,
    return
  }
  func.func @transform_0(%arg0: i32) -> (i32, i32) {
    %c0_i32 = arith.constant 0 : i32
    %c0_i32_0 = arith.constant 0 : i32
    return %arg0, %c0_i32 : i32, i32
  }
  func.func @transform_1(%arg0: i32) -> (i32, i32) {
    %c0_i32 = arith.constant 0 : i32
    %c0_i32_0 = arith.constant 0 : i32
    %c0_i32_1 = arith.constant 0 : i32
    return %c0_i32, %c0_i32_0 : i32, i32
  }
  func.func @transform_2(%arg0: i32) -> (i32, i32) {
    %c0_i32 = arith.constant 0 : i32
    %c0_i32_0 = arith.constant 0 : i32
    %c0_i32_1 = arith.constant 0 : i32
    return %c0_i32, %c0_i32_0 : i32, i32
  }
  func.func @transform_3(%arg0: i32) -> (i32, i32) {
    %c0_i32 = arith.constant 0 : i32
    %c0_i32_0 = arith.constant 0 : i32
    %c0_i32_1 = arith.constant 0 : i32
    return %c0_i32, %c0_i32_0 : i32, i32
  }
  func.func @transform_4(%arg0: i32) -> (i32, i32) {
    %c0_i32 = arith.constant 0 : i32
    %c0_i32_0 = arith.constant 0 : i32
    %c0_i32_1 = arith.constant 0 : i32
    return %c0_i32, %c0_i32_0 : i32, i32
  }
  func.func @transform_5(%arg0: i32) -> (i32, i32) {
    %c0_i32 = arith.constant 0 : i32
    %c0_i32_0 = arith.constant 0 : i32
    %c0_i32_1 = arith.constant 0 : i32
    return %c0_i32, %c0_i32_0 : i32, i32
  }
  func.func @transform_6(%arg0: i32) -> (i32, i32) {
    %c0_i32 = arith.constant 0 : i32
    %c0_i32_0 = arith.constant 0 : i32
    %c0_i32_1 = arith.constant 0 : i32
    return %c0_i32, %c0_i32_0 : i32, i32
  }
  func.func @transform_7(%arg0: i32) -> (i32, i32) {
    %c0_i32 = arith.constant 0 : i32
    %c0_i32_0 = arith.constant 0 : i32
    return %arg0, %c0_i32 : i32, i32
  }
}

module attributes {stable_mosaic.version = 11 : i64} {
  func.func @_aux_head_kernel(%arg0: i32, %arg1: memref<32x128xbf16, #tpu.memory_space<vmem>>, %arg2: memref<128x384xbf16, #tpu.memory_space<vmem>>, %arg3: memref<1x128xf32, #tpu.memory_space<vmem>>, %arg4: memref<32x1xf32, #tpu.memory_space<vmem>>, %arg5: memref<32x1xf32, #tpu.memory_space<vmem>>, %arg6: memref<128x128xbf16, #tpu.memory_space<vmem>>, %arg7: memref<64x32xbf16, #tpu.memory_space<vmem>>, %arg8: memref<64x128xbf16, #tpu.memory_space<vmem>>) attributes {dimension_semantics = [#tpu.dimension_semantics<parallel>], iteration_bounds = array<i64: 1>, scalar_prefetch = 0 : i64, scratch_operands = 0 : i64, tpu.core_type = #tpu.core_type<tc>, window_params = [{transform_indices = @transform_0, window_bounds = array<i64: 32, 128>}, {pipeline_mode = #tpu.pipeline_mode<synchronous>, transform_indices = @transform_1, window_bounds = array<i64: 128, 384>}, {pipeline_mode = #tpu.pipeline_mode<synchronous>, transform_indices = @transform_2, window_bounds = array<i64: 1, 128>}, {pipeline_mode = #tpu.pipeline_mode<synchronous>, transform_indices = @transform_3, window_bounds = array<i64: 32, 1>}, {pipeline_mode = #tpu.pipeline_mode<synchronous>, transform_indices = @transform_4, window_bounds = array<i64: 32, 1>}, {pipeline_mode = #tpu.pipeline_mode<synchronous>, transform_indices = @transform_5, window_bounds = array<i64: 128, 128>}, {pipeline_mode = #tpu.pipeline_mode<synchronous>, transform_indices = @transform_6, window_bounds = array<i64: 64, 32>}, {transform_indices = @transform_7, window_bounds = array<i64: 64, 128>}]} {
    %c0 = arith.constant 0 : index
    %c0_0 = arith.constant 0 : index
    %0 = vector.load %arg1[%c0, %c0_0] : memref<32x128xbf16, #tpu.memory_space<vmem>>, vector<32x128xbf16>
    %c0_1 = arith.constant 0 : index
    %c0_2 = arith.constant 0 : index
    %1 = vector.load %arg2[%c0_1, %c0_2] : memref<128x384xbf16, #tpu.memory_space<vmem>>, vector<128x384xbf16>
    %cst = arith.constant dense<0.000000e+00> : vector<32x384xf32>
    %2 = tpu.matmul %0, %1, %cst {dimension_numbers = #tpu.dot_dimension_numbers<[1], [0], [0], [1], [0, 0, 1, 1], [], []>} : vector<32x128xbf16>, vector<128x384xbf16>, vector<32x384xf32> -> vector<32x384xf32>
    %3 = vector.extract_strided_slice %2 {offsets = [0, 0], sizes = [32, 128], strides = [1, 1]} : vector<32x384xf32> to vector<32x128xf32>
    %4 = vector.extract_strided_slice %2 {offsets = [0, 128], sizes = [32, 128], strides = [1, 1]} : vector<32x384xf32> to vector<32x128xf32>
    %5 = vector.extract_strided_slice %2 {offsets = [0, 256], sizes = [32, 128], strides = [1, 1]} : vector<32x384xf32> to vector<32x128xf32>
    %c1_i32 = arith.constant 1 : i32
    %6 = tpu.dynamic_rotate %3 by %c1_i32 dim 0 : vector<32x128xf32>, i32 -> vector<32x128xf32>
    %c0_3 = arith.constant 0 : index
    %c0_4 = arith.constant 0 : index
    %7 = vector.load %arg4[%c0_3, %c0_4] : memref<32x1xf32, #tpu.memory_space<vmem>>, vector<32x1xf32>
    %8 = vector.broadcast %7 : vector<32x1xf32> to vector<32x128xf32>
    %9 = arith.mulf %6, %8 : vector<32x128xf32>
    %c31_i32 = arith.constant 31 : i32
    %10 = tpu.dynamic_rotate %5 by %c31_i32 dim 0 : vector<32x128xf32>, i32 -> vector<32x128xf32>
    %c0_5 = arith.constant 0 : index
    %c0_6 = arith.constant 0 : index
    %11 = vector.load %arg5[%c0_5, %c0_6] : memref<32x1xf32, #tpu.memory_space<vmem>>, vector<32x1xf32>
    %12 = vector.broadcast %11 : vector<32x1xf32> to vector<32x128xf32>
    %13 = arith.mulf %10, %12 : vector<32x128xf32>
    %14 = arith.addf %4, %9 : vector<32x128xf32>
    %15 = arith.addf %14, %13 : vector<32x128xf32>
    %c0_7 = arith.constant 0 : index
    %c0_8 = arith.constant 0 : index
    %16 = vector.load %arg3[%c0_7, %c0_8] : memref<1x128xf32, #tpu.memory_space<vmem>>, vector<1x128xf32>
    %17 = vector.broadcast %16 : vector<1x128xf32> to vector<32x128xf32>
    %18 = arith.addf %15, %17 : vector<32x128xf32>
    %cst_9 = arith.constant 0.000000e+00 : f32
    %cst_10 = arith.constant 6.000000e+00 : f32
    %19 = vector.broadcast %cst_9 : f32 to vector<32x128xf32>
    %20 = arith.maximumf %19, %18 : vector<32x128xf32>
    %21 = vector.broadcast %cst_10 : f32 to vector<32x128xf32>
    %22 = arith.minimumf %21, %20 : vector<32x128xf32>
    %23 = arith.truncf %22 : vector<32x128xf32> to vector<32x128xbf16>
    %c0_11 = arith.constant 0 : index
    %c0_12 = arith.constant 0 : index
    %24 = vector.load %arg6[%c0_11, %c0_12] : memref<128x128xbf16, #tpu.memory_space<vmem>>, vector<128x128xbf16>
    %cst_13 = arith.constant dense<0.000000e+00> : vector<32x128xf32>
    %25 = tpu.matmul %23, %24, %cst_13 {dimension_numbers = #tpu.dot_dimension_numbers<[1], [0], [0], [1], [0, 0, 1, 1], [], []>} : vector<32x128xbf16>, vector<128x128xbf16>, vector<32x128xf32> -> vector<32x128xf32>
    %c0_14 = arith.constant 0 : index
    %c0_15 = arith.constant 0 : index
    %26 = vector.load %arg7[%c0_14, %c0_15] : memref<64x32xbf16, #tpu.memory_space<vmem>>, vector<64x32xbf16>
    %27 = arith.truncf %25 : vector<32x128xf32> to vector<32x128xbf16>
    %cst_16 = arith.constant dense<0.000000e+00> : vector<64x128xf32>
    %28 = tpu.matmul %26, %27, %cst_16 {dimension_numbers = #tpu.dot_dimension_numbers<[1], [0], [0], [1], [0, 0, 1, 1], [], []>} : vector<64x32xbf16>, vector<32x128xbf16>, vector<64x128xf32> -> vector<64x128xf32>
    %29 = arith.truncf %28 : vector<64x128xf32> to vector<64x128xbf16>
    %c0_17 = arith.constant 0 : index
    %c0_18 = arith.constant 0 : index
    %30 = vector.load %arg8[%c0_17, %c0_18] : memref<64x128xbf16, #tpu.memory_space<vmem>>, vector<64x128xbf16>
    tpu.vector_store %arg8[%c0_17, %c0_18], %29 {strides = array<i32>} : memref<64x128xbf16, #tpu.memory_space<vmem>>, vector<64x128xbf16>,
    return
  }
  func.func @transform_0(%arg0: i32) -> (i32, i32) {
    %c0_i32 = arith.constant 0 : i32
    %c0_i32_0 = arith.constant 0 : i32
    return %arg0, %c0_i32 : i32, i32
  }
  func.func @transform_1(%arg0: i32) -> (i32, i32) {
    %c0_i32 = arith.constant 0 : i32
    %c0_i32_0 = arith.constant 0 : i32
    %c0_i32_1 = arith.constant 0 : i32
    return %c0_i32, %c0_i32_0 : i32, i32
  }
  func.func @transform_2(%arg0: i32) -> (i32, i32) {
    %c0_i32 = arith.constant 0 : i32
    %c0_i32_0 = arith.constant 0 : i32
    %c0_i32_1 = arith.constant 0 : i32
    return %c0_i32, %c0_i32_0 : i32, i32
  }
  func.func @transform_3(%arg0: i32) -> (i32, i32) {
    %c0_i32 = arith.constant 0 : i32
    %c0_i32_0 = arith.constant 0 : i32
    %c0_i32_1 = arith.constant 0 : i32
    return %c0_i32, %c0_i32_0 : i32, i32
  }
  func.func @transform_4(%arg0: i32) -> (i32, i32) {
    %c0_i32 = arith.constant 0 : i32
    %c0_i32_0 = arith.constant 0 : i32
    %c0_i32_1 = arith.constant 0 : i32
    return %c0_i32, %c0_i32_0 : i32, i32
  }
  func.func @transform_5(%arg0: i32) -> (i32, i32) {
    %c0_i32 = arith.constant 0 : i32
    %c0_i32_0 = arith.constant 0 : i32
    %c0_i32_1 = arith.constant 0 : i32
    return %c0_i32, %c0_i32_0 : i32, i32
  }
  func.func @transform_6(%arg0: i32) -> (i32, i32) {
    %c0_i32 = arith.constant 0 : i32
    %c0_i32_0 = arith.constant 0 : i32
    %c0_i32_1 = arith.constant 0 : i32
    return %c0_i32, %c0_i32_0 : i32, i32
  }
  func.func @transform_7(%arg0: i32) -> (i32, i32) {
    %c0_i32 = arith.constant 0 : i32
    %c0_i32_0 = arith.constant 0 : i32
    return %arg0, %c0_i32 : i32, i32
  }
}

</mosaic_0001>

<bundles_post_ra>
// kernel: tpu_custom_call.1
= control target key start
LH: loop header
LB: loop body
LE: loop exit
PB: predicated region body
PF: predicated region fallthrough
CT: control target
= control target key end

     0   :  { %12 = vsyncpa [#allocation3], 0  ;;  %s982_s0 = inlined_call_operand.vmem [shape: bf16[32,128], index: 0, kind: input, shape index: {}]   ;;  %s983_s1 = inlined_call_operand.hbm [shape: bf16[128,384], index: 1, kind: input, shape index: {}]   ;;  %s984_s2 = inlined_call_operand.vmem [shape: f32[1,128], index: 2, kind: input, shape index: {}]   ;;  %s985_s3 = inlined_call_operand.vmem [shape: f32[32,1], index: 3, kind: input, shape index: {}]   ;;  %s986_s4 = inlined_call_operand.vmem [shape: f32[32,1], index: 4, kind: input, shape index: {}]   ;;  %s987_s5 = inlined_call_operand.vmem [shape: bf16[128,128], index: 5, kind: input, shape index: {}]   ;;  %s988_s6 = inlined_call_operand.vmem [shape: bf16[64,32], index: 6, kind: input, shape index: {}]   ;;  %s989_s7 = inlined_call_operand.hbm [shape: bf16[64,128], index: 7, kind: output, shape index: {}]  }
   0x1   :  { %13 = vsyncpa [#allocation4], 0  ;;  %s20_s26 = sshll.u32 %s983_s1, 4  ;;  %s849_s27 = smov [#allocation2]   ;;  %s21_s26 = int_to_ptr.hbm [resolvable:$true] %s20_s26 }
   0x2   :  { %s22_s28 = sshll.u32 %s849_s27, 4  ;;  %s850_s29 = smov 192   ;;  %s23_s28 = int_to_ptr.vmem [resolvable:$true] %s22_s28 }
   0x3   :  { %s851_s30 = smov 12  }
   0x4   :  { %28 = dma.hbm_to_vmem [thread:$0]  %s21_s26, 3072, %s23_s28, [#allocation3], %s850_s29, %s850_s29, %s851_s30  }
   0x5   :  { %845 = dma.done.wait [#allocation3], 3072  }
   0x6   :  { %846 = vsyncadd [#allocation3], 4294964224  ;;  %v663_v0 = vld [vmem:[#allocation2 + $0xa8] sm:$0xf]  ;;  %v749_v1 = vld [vmem:[#allocation2 + $0xb0] sm:$0xf0] }
   0x7   :  { %v671_v2 = vld [vmem:[#allocation2 + $0xb0] sm:$0xf]  ;;  %v664_v3 = vor.u32 %v749_v1, %v663_v0  ;;  %v750_v4 = vld [vmem:[#allocation2 + $0xb8] sm:$0xf0]  ;;  %v659_v8 = vld [vmem:[#allocation2 + $0x98] sm:$0xf] }
   0x8   :  { %v651_v5 = vld [vmem:[#allocation2 + $0x90] sm:$0xf]  ;;  %v746_v6 = vld [vmem:[#allocation2 + $0x98] sm:$0xf0]  ;;  %v672_v7 = vor.u32 %v750_v4, %v671_v2  ;;  %v747_v9 = vld [vmem:[#allocation2 + $0xa0] sm:$0xf0] }
   0x9   :  { %220 = vmatpush.bf16.msra.mxu1 %v664_v3  ;;  %v652_v10 = vor.u32 %v746_v6, %v651_v5  ;;  %v660_v11 = vor.u32 %v747_v9, %v659_v8  ;;  %v639_v12 = vld [vmem:[#allocation2 + $0x78] sm:$0xf]  ;;  %v743_v13 = vld [vmem:[#allocation2 + $0x80] sm:$0xf0]  ;;  %v647_v14 = vld [vmem:[#allocation2 + $0x80] sm:$0xf] }
   0xa   :  { %258 = vmatpush.bf16.msra.mxu2 %v672_v7  ;;  %v744_v15 = vld [vmem:[#allocation2 + $0x88] sm:$0xf0]  ;;  %v640_v16 = vor.u32 %v743_v13, %v639_v12  ;;  %v627_v18 = vld [vmem:[#allocation2 + $0x60] sm:$0xf]  ;;  %v635_v20 = vld [vmem:[#allocation2 + $0x68] sm:$0xf] }
   0xb   :  { %v648_v17 = vor.u32 %v744_v15, %v647_v14  ;;  %v740_v19 = vld [vmem:[#allocation2 + $0x68] sm:$0xf0]  ;;  %v741_v21 = vld [vmem:[#allocation2 + $0x70] sm:$0xf0]  ;;  %v615_v24 = vld [vmem:[#allocation2 + $0x48] sm:$0xf] }
   0xc   :  { %v628_v22 = vor.u32 %v740_v19, %v627_v18  ;;  %v636_v23 = vor.u32 %v741_v21, %v635_v20  ;;  %v737_v25 = vld [vmem:[#allocation2 + $0x50] sm:$0xf0]  ;;  %v623_v26 = vld [vmem:[#allocation2 + $0x50] sm:$0xf]  ;;  %v738_v27 = vld [vmem:[#allocation2 + $0x58] sm:$0xf0] }
   0xd   :  { %221 = vmatpush.bf16.msra.mxu1 %v652_v10  ;;  %v288_v28 = vld [vmem:[%s985_s3] sm:$0xff]  ;;  %v852_v29 = vmov 0   ;;  %v616_v30 = vor.u32 %v737_v25, %v615_v24  ;;  %v624_v31 = vor.u32 %v738_v27, %v623_v26  ;;  %v603_v32 = vld [vmem:[#allocation2 + $0x30] sm:$0xf]  ;;  %v734_v33 = vld [vmem:[#allocation2 + $0x38] sm:$0xf0] }
   0xe   :  { %259 = vmatpush.bf16.msra.mxu2 %v660_v11  ;;  %793 = vset.pattern.permute.xlu0 %v852_v29  ;;  %v611_v34 = vld [vmem:[#allocation2 + $0x38] sm:$0xf]  ;;  %v735_v35 = vld [vmem:[#allocation2 + $0x40] sm:$0xf0]  ;;  %v604_v36 = vor.u32 %v734_v33, %v603_v32  ;;  %v289_v40 = vld [vmem:[%s985_s3 + $0x8] sm:$0xff]  ;;  %vm492_vm2 = vcmask 261120  }
   0xf   :  { %794 = vset.pattern.permute.xlu1 %v852_v29  ;;  %294 = vperm.xlu0 %793, %v288_v28   ;;  %v612_v37 = vor.u32 %v735_v35, %v611_v34  ;;  %v591_v38 = vld [vmem:[#allocation2 + $0x18] sm:$0xf]  ;;  %v731_v39 = vld [vmem:[#allocation2 + $0x20] sm:$0xf0]  ;;  %v599_v41 = vld [vmem:[#allocation2 + $0x20] sm:$0xf] }
  0x10   :  { %795 = vset.pattern.permute.xlu2 %v852_v29  ;;  %v732_v42 = vld [vmem:[#allocation2 + $0x28] sm:$0xf0]  ;;  %v592_v43 = vor.u32 %v731_v39, %v591_v38  ;;  %v579_v44 = vld [vmem:[#allocation2] sm:$0xf]  ;;  %v587_v47 = vld [vmem:[#allocation2 + $0x8] sm:$0xf] }
  0x11   :  { %222 = vmatpush.bf16.msra.mxu1 %v640_v16  ;;  %v600_v45 = vor.u32 %v732_v42, %v599_v41  ;;  %v728_v46 = vld [vmem:[#allocation2 + $0x8] sm:$0xf0]  ;;  %v325_v48 = vld [vmem:[%s986_s4] sm:$0xff]  ;;  %v729_v49 = vld [vmem:[#allocation2 + $0x10] sm:$0xf0]  ;;  %s853_s24 = smov [#allocation5]  }
  0x12   :  { %260 = vmatpush.bf16.msra.mxu2 %v648_v17  ;;  %v748_v50 = vld [vmem:[#allocation2 + $0xac] sm:$0xf]  ;;  %v665_v51 = vld [vmem:[#allocation2 + $0xb4] sm:$0xf0]  ;;  %331 = vperm.xlu1 %794, %v325_v48   ;;  %v580_v52 = vor.u32 %v728_v46, %v579_v44  ;;  %v588_v53 = vor.u32 %v729_v49, %v587_v47  ;;  %v745_v55 = vld [vmem:[#allocation2 + $0x94] sm:$0xf] }
  0x13   :  { %v668_v54 = vor.u32 %v748_v50, %v665_v51  ;;  %v653_v56 = vld [vmem:[#allocation2 + $0x9c] sm:$0xf0]  ;;  %v742_v59 = vld [vmem:[#allocation2 + $0x7c] sm:$0xf]  ;;  %v641_v60 = vld [vmem:[#allocation2 + $0x84] sm:$0xf0] }
  0x14   :  { %v725_v57 = vld [vmem:[%s982_s0] sm:$0xff]  ;;  %v656_v58 = vor.u32 %v745_v55, %v653_v56  ;;  %v326_v61 = vld [vmem:[%s986_s4 + $0x8] sm:$0xff]  ;;  %v327_v62 = vld [vmem:[%s986_s4 + $0x10] sm:$0xff]  ;;  %v644_v63 = vor.u32 %v742_v59, %v641_v60  ;;  %s854_s26 = smov 64   ;;  %s855_s27 = smov 4  }
  0x15   :  { %223 = vmatpush.bf16.msra.mxu1 %v628_v22  ;;  %v739_v0 = vld [vmem:[#allocation2 + $0x64] sm:$0xf]  ;;  %v629_v1 = vld [vmem:[#allocation2 + $0x6c] sm:$0xf0]  ;;  %v328_v3 = vld [vmem:[%s986_s4 + $0x18] sm:$0xff]  ;;  %s554_s4 = sshll.u32 %s853_s24, 4  ;;  %s555_s4 = int_to_ptr.vmem [resolvable:$true] %s554_s4 }
  0x16   :  { %261 = vmatpush.bf16.msra.mxu2 %v636_v23  ;;  %v632_v2 = vor.u32 %v739_v0, %v629_v1  ;;  %v736_v4 = vld [vmem:[#allocation2 + $0x4c] sm:$0xf]  ;;  %v617_v5 = vld [vmem:[#allocation2 + $0x54] sm:$0xf0]  ;;  %v733_v7 = vld [vmem:[#allocation2 + $0x34] sm:$0xf] }
  0x17   :  { %299 = vperm.xlu0 %793, %v289_v40   ;;  %v620_v6 = vor.u32 %v736_v4, %v617_v5  ;;  %v605_v8 = vld [vmem:[#allocation2 + $0x3c] sm:$0xf0]  ;;  %v726_v9 = vld [vmem:[%s982_s0 + $0x8] sm:$0xff]  ;;  %v730_v11 = vld [vmem:[#allocation2 + $0x1c] sm:$0xf] }
  0x18   :  { %v608_v10 = vor.u32 %v733_v7, %v605_v8  ;;  %v593_v12 = vld [vmem:[#allocation2 + $0x24] sm:$0xf0]  ;;  %v290_v13 = vld [vmem:[%s985_s3 + $0x10] sm:$0xff]  ;;  %v727_v15 = vld [vmem:[#allocation2 + $0x4] sm:$0xf] }
  0x19   :  { %224 = vmatpush.bf16.msra.mxu1 %v616_v30  ;;  %304 = vperm.xlu2 %795, %v290_v13   ;;  %v596_v14 = vor.u32 %v730_v11, %v593_v12  ;;  %v581_v16 = vld [vmem:[#allocation2 + $0xc] sm:$0xf0]  ;;  %v291_v18 = vld [vmem:[%s985_s3 + $0x18] sm:$0xff]  ;;  %v756_v21 = vld [vmem:[%s987_s5 + $0x28] sm:$0xff] }
  0x1a   :  { %262 = vmatpush.bf16.msra.mxu2 %v624_v31  ;;  %336 = vperm.xlu1 %794, %v326_v61   ;;  %v584_v17 = vor.u32 %v727_v15, %v581_v16  ;;  %v758_v19 = vld [vmem:[%s987_s5 + $0x38] sm:$0xff]  ;;  %v757_v20 = vld [vmem:[%s987_s5 + $0x30] sm:$0xff]  ;;  %v755_v23 = vld [vmem:[%s987_s5 + $0x20] sm:$0xff]  ;;  %v281_v31 = vlaneseq }
  0x1b   :  { %443 = vmatpush.bf16.msra.mxu3 %v758_v19  ;;  %v754_v24 = vld [vmem:[%s987_s5 + $0x18] sm:$0xff]  ;;  %v753_v26 = vld [vmem:[%s987_s5 + $0x10] sm:$0xff]  ;;  %v752_v28 = vld [vmem:[%s987_s5 + $0x8] sm:$0xff] }
  0x1c   :  { %v751_v30 = vld [vmem:[%s987_s5] sm:$0xff]  ;;  %v282_v33 = vshrl.u32 %v281_v31, 7 }
  0x1d   :  { %225 = vmatpush.bf16.msra.mxu1 %v604_v36 }
  0x1e   :  { %263 = vmatpush.bf16.msra.mxu2 %v612_v37  ;;  %vm283_vm0 = vcmp.lt.s32.totalorder %v282_v33, 1  ;;  %vm320_vm1 = vcmp.lt.s32.totalorder %v282_v33, 7 }
  0x1f   :  { %341 = vperm.xlu0 %793, %v327_v62   ;;  %444 = vmatpush.bf16.msra.mxu3 %v757_v20 }
  0x21   :  { %226 = vmatpush.bf16.msra.mxu1 %v592_v43  ;;  %309 = vperm.xlu2 %795, %v291_v18  }
  0x22   :  { %264 = vmatpush.bf16.msra.mxu2 %v600_v45  ;;  %346 = vperm.xlu1 %794, %v328_v3  }
  0x23   :  { %445 = vmatpush.bf16.msra.mxu3 %v756_v21 }
  0x25   :  { %227 = vmatpush.bf16.msra.mxu1 %v580_v52 }
  0x26   :  { %265 = vmatpush.bf16.msra.mxu2 %v588_v53  ;;  %v796_v53 = vld [vmem:[%s984_s2] ss:$0 sm:$0xff] }
  0x27   :  { %446 = vmatpush.bf16.msra.mxu3 %v755_v23 }
  0x28   :  { %228 = vmatmul.bf16.vlgmr.msra.gmra.mxu1 %v725_v57 }
  0x29   :  { %239 = vmatpush.bf16.msrb.mxu1 %v668_v54  ;;  %266 = vmatmul.bf16.vlgmr.msra.gmra.mxu2 %v725_v57 }
  0x2b   :  { %447 = vmatpush.bf16.msra.mxu3 %v754_v24 }
  0x2d   :  { %240 = vmatpush.bf16.msrb.mxu1 %v656_v58 }
  0x2f   :  { %448 = vmatpush.bf16.msra.mxu3 %v753_v26 }
  0x31   :  { %241 = vmatpush.bf16.msrb.mxu1 %v644_v63 }
  0x33   :  { %449 = vmatpush.bf16.msra.mxu3 %v752_v28 }
  0x35   :  { %242 = vmatpush.bf16.msrb.mxu1 %v632_v2 }
  0x37   :  { %450 = vmatpush.bf16.msra.mxu3 %v751_v30 }
  0x38   :  { %233 = vmatmul.bf16.gmra.mxu1 %v726_v9 }
  0x39   :  { %243 = vmatpush.bf16.msrb.mxu1 %v620_v6  ;;  %271 = vmatmul.bf16.gmra.mxu2 %v726_v9 }
  0x3d   :  { %244 = vmatpush.bf16.msrb.mxu1 %v608_v10 }
  0x41   :  { %245 = vmatpush.bf16.msrb.mxu1 %v596_v14 }
  0x45   :  { %246 = vmatpush.bf16.msrb.mxu1 %v584_v17 }
  0x48   :  { %247 = vmatmul.bf16.vlgmr.msrb.gmra.mxu1 %v725_v57 }
  0x58   :  { %252 = vmatmul.bf16.gmra.mxu1 %v726_v9 }
  0x73   :  { %v305_v63 = vpop.permute.xlu2 %304 }
  0x7b   :  { %v310_v15 = vpop.permute.xlu2 %309 }
  0x81   :  { %v295_v37 = vpop.permute.xlu0 %294 }
  0x84   :  { %v332_v40 = vpop.permute.xlu1 %331 }
  0x89   :  { %v300_v50 = vpop.permute.xlu0 %299 }
  0x8c   :  { %v337_v54 = vpop.permute.xlu1 %336 }
  0x91   :  { %v342_v12 = vpop.permute.xlu0 %341 }
  0x94   :  { %v347_v18 = vpop.permute.xlu1 %346 }
  0xa5   :  { %v229_v22 = vpop.f32.mrf.mxu1 }
  0xa6   :  { %v277_v36 = vrot.slane %v229_v22, 7 }
  0xac   :  { %v947_v27 = vpop.f32.mrf.mxu2 }
  0xad   :  { %v231_v25 = vpop.f32.mrf.mxu1  ;;  %v316_v38 = vrot.slane %v947_v27, 1 }
  0xae   :  { %v278_v44 = vrot.slane %v231_v25, 7 }
  0xb0   :  { %v286_v51 = vsel %vm283_vm0, %v277_v36, %v278_v44 }
  0xb1   :  { %v313_v56 = vmul.f32 %v300_v50, %v286_v51 }
  0xb4   :  { %v269_v32 = vpop.f32.mrf.mxu2 }
  0xb5   :  { %v234_v29 = vpop.f32.mrf.mxu1  ;;  %v317_v39 = vrot.slane %v269_v32, 1 }
  0xb6   :  { %v279_v57 = vrot.slane %v234_v29, 7 }
  0xb7   :  { %v323_v45 = vsel %vm320_vm1, %v316_v38, %v317_v39 }
  0xb8   :  { %v349_v49 = vmul.f32 %v332_v40, %v323_v45  ;;  %v285_v1 = vsel %vm283_vm0, %v278_v44, %v279_v57  ;;  %v761_v40 = vld [vmem:[%s988_s6 + $0x10] sm:$0xff] }
  0xb9   :  { %v314_v5 = vmul.f32 %v305_v63, %v285_v1 }
  0xbc   :  { %v272_v42 = vpop.f32.mrf.mxu2 }
  0xbd   :  { %v236_v34 = vpop.f32.mrf.mxu1  ;;  %v318_v48 = vrot.slane %v272_v42, 1 }
  0xbe   :  { %v280_v35 = vrot.slane %v236_v34, 7 }
  0xbf   :  { %v322_v55 = vsel %vm320_vm1, %v317_v39, %v318_v48  ;;  %v760_v39 = vld [vmem:[%s988_s6 + $0x8] sm:$0xff] }
  0xc0   :  { %v287_v41 = vsel %vm283_vm0, %v280_v35, %v277_v36  ;;  %v350_v59 = vmul.f32 %v337_v54, %v322_v55  ;;  %v284_v16 = vsel %vm283_vm0, %v279_v57, %v280_v35 }
  0xc1   :  { %v312_v43 = vmul.f32 %v295_v37, %v287_v41  ;;  %v315_v20 = vmul.f32 %v310_v15, %v284_v16  ;;  %v762_v41 = vld [vmem:[%s988_s6 + $0x18] sm:$0xff] }
  0xc4   :  { %v274_v60 = vpop.f32.mrf.mxu2 }
  0xc5   :  { %v248_v46 = vpop.f32.mrf.mxu1  ;;  %v319_v2 = vrot.slane %v274_v60, 1 }
  0xc6   :  { %v353_v47 = vadd.f32 %v312_v43, %v248_v46 }
  0xc7   :  { %v321_v7 = vsel %vm320_vm1, %v318_v48, %v319_v2  ;;  %v324_v19 = vsel %vm320_vm1, %v319_v2, %v316_v38  ;;  %v759_v38 = vld [vmem:[%s988_s6] sm:$0xff]  ;;  %s556_s6 = sshll.u32 %s989_s7, 4  ;;  %s557_s6 = int_to_ptr.hbm [resolvable:$true] %s556_s6 }
  0xc8   :  { %v357_v52 = vadd.f32 %v353_v47, %v349_v49  ;;  %v351_v13 = vmul.f32 %v342_v12, %v321_v7  ;;  %v352_v22 = vmul.f32 %v347_v18, %v324_v19 }
  0xca   :  { %v365_v62 = vadd.f32 %v796_v53, %v357_v52 }
  0xcc   :  { %v369_v4 = vmax.f32 %v365_v62, 0.0 }
  0xcd   :  { %v250_v58 = vpop.f32.mrf.mxu1 }
  0xce   :  { %v354_v61 = vadd.f32 %v313_v56, %v250_v58  ;;  %v373_v10 = vmin.f32 %v369_v4, 6.0 }
  0xd0   :  { %v358_v0 = vadd.f32 %v354_v61, %v350_v59 }
  0xd2   :  { %v366_v3 = vadd.f32 %v796_v53, %v358_v0 }
  0xd4   :  { %v370_v6 = vmax.f32 %v366_v3, 0.0 }
  0xd5   :  { %v253_v8 = vpop.f32.mrf.mxu1 }
  0xd6   :  { %v355_v9 = vadd.f32 %v314_v5, %v253_v8  ;;  %v374_v11 = vmin.f32 %v370_v6, 6.0 }
  0xd8   :  { %v377_v14 = vpack.c.bf16 %v374_v11, %v373_v10  ;;  %v359_v17 = vadd.f32 %v355_v9, %v351_v13 }
  0xda   :  { %451 = vmatmul.bf16.vlgmr.msra.gmra.mxu3 %v377_v14  ;;  %v367_v24 = vadd.f32 %v796_v53, %v359_v17 }
  0xdc   :  { %v371_v27 = vmax.f32 %v367_v24, 0.0 }
  0xdd   :  { %v255_v21 = vpop.f32.mrf.mxu1 }
  0xde   :  { %v356_v23 = vadd.f32 %v315_v20, %v255_v21  ;;  %v375_v29 = vmin.f32 %v371_v27, 6.0 }
  0xe0   :  { %v360_v25 = vadd.f32 %v356_v23, %v352_v22 }
  0xe2   :  { %v368_v26 = vadd.f32 %v796_v53, %v360_v25 }
  0xe4   :  { %v372_v28 = vmax.f32 %v368_v26, 0.0 }
  0xe6   :  { %v376_v30 = vmin.f32 %v372_v28, 6.0 }
  0xe8   :  { %v378_v31 = vpack.c.bf16 %v376_v30, %v375_v29 }
  0xea   :  { %456 = vmatmul.bf16.gmra.mxu3 %v378_v31 }
 0x15d   :  { %v452_v32 = vpop.f32.mrf.mxu3 }
 0x165   :  { %v454_v34 = vpop.f32.mrf.mxu3 }
 0x166   :  { %v470_v33 = vpack.c.bf16 %v454_v34, %v452_v32 }
 0x16d   :  { %v457_v35 = vpop.f32.mrf.mxu3 }
 0x175   :  { %v459_v36 = vpop.f32.mrf.mxu3 }
 0x176   :  { %v471_v37 = vpack.c.bf16 %v459_v36, %v457_v35 }
 0x178   :  { %511 = vmatpush.bf16.msra.mxu0 %v471_v37 }
 0x17c   :  { %512 = vmatpush.bf16.msra.mxu0 %v470_v33 }
 0x17f   :  { %721 = vmatmul.msk.bf16.vlgmr.msra.gmra.mxu0 %vm492_vm2, %v759_v38 }
 0x18f   :  { %722 = vmatmul.msk.bf16.gmra.mxu0 %vm492_vm2, %v760_v39 }
 0x19f   :  { %723 = vmatmul.msk.bf16.gmra.mxu0 %vm492_vm2, %v761_v40 }
 0x1af   :  { %724 = vmatmul.msk.bf16.gmra.mxu0 %vm492_vm2, %v762_v41 }
 0x1fc   :  { %v514_v42 = vpop.f32.mrf.mxu0 }
 0x204   :  { %v516_v43 = vpop.f32.mrf.mxu0 }
 0x205   :  { %v766_v44 = vpack.c.bf16 %v516_v43, %v514_v42 }
 0x207   :  { %767 = vst [vmem:[#allocation5] sm:$0xff] %v766_v44  }
 0x20c   :  { %v519_v45 = vpop.f32.mrf.mxu0 }
 0x214   :  { %v521_v46 = vpop.f32.mrf.mxu0 }
 0x215   :  { %v771_v47 = vpack.c.bf16 %v521_v46, %v519_v45 }
 0x217   :  { %783 = vst [vmem:[#allocation5 + $0x8] sm:$0xff] %v771_v47  }
 0x21c   :  { %v524_v48 = vpop.f32.mrf.mxu0 }
 0x224   :  { %v526_v49 = vpop.f32.mrf.mxu0 }
 0x225   :  { %v776_v50 = vpack.c.bf16 %v526_v49, %v524_v48 }
 0x227   :  { %784 = vst [vmem:[#allocation5 + $0x10] sm:$0xff] %v776_v50  }
 0x22c   :  { %v529_v51 = vpop.f32.mrf.mxu0 }
 0x234   :  { %v531_v52 = vpop.f32.mrf.mxu0 }
 0x235   :  { %v781_v53 = vpack.c.bf16 %v531_v52, %v529_v51 }
 0x237   :  { %785 = vst [vmem:[#allocation5 + $0x18] sm:$0xff] %v781_v53  }
 0x238   :  { %562 = dma.vmem_to_hbm [thread:$0]  %s555_s4, 512, %s557_s6, [#allocation4], %s854_s26, %s854_s26, %s855_s27  }
 0x239   :  { %847 = dma.done.wait [#allocation4], 512  }
 0x23a   :  { %848 = vsyncadd [#allocation4], 4294966784 }
 0x23b   :  { %567 = vsyncpa [#allocation3], 1 }
 0x23c   :  { %568 = vsyncpa [#allocation4], 1 }

// kernel: tpu_custom_call.1
= control target key start
LH: loop header
LB: loop body
LE: loop exit
PB: predicated region body
PF: predicated region fallthrough
CT: control target
= control target key end

     0   :  { %12 = vsyncpa [#allocation3], 0  ;;  %s982_s0 = inlined_call_operand.vmem [shape: bf16[32,128], index: 0, kind: input, shape index: {}]   ;;  %s983_s1 = inlined_call_operand.hbm [shape: bf16[128,384], index: 1, kind: input, shape index: {}]   ;;  %s984_s2 = inlined_call_operand.vmem [shape: f32[1,128], index: 2, kind: input, shape index: {}]   ;;  %s985_s3 = inlined_call_operand.vmem [shape: f32[32,1], index: 3, kind: input, shape index: {}]   ;;  %s986_s4 = inlined_call_operand.vmem [shape: f32[32,1], index: 4, kind: input, shape index: {}]   ;;  %s987_s5 = inlined_call_operand.vmem [shape: bf16[128,128], index: 5, kind: input, shape index: {}]   ;;  %s988_s6 = inlined_call_operand.vmem [shape: bf16[64,32], index: 6, kind: input, shape index: {}]   ;;  %s989_s7 = inlined_call_operand.hbm [shape: bf16[64,128], index: 7, kind: output, shape index: {}]  }
   0x1   :  { %13 = vsyncpa [#allocation4], 0  ;;  %s20_s26 = sshll.u32 %s983_s1, 4  ;;  %s849_s27 = smov [#allocation2]   ;;  %s21_s26 = int_to_ptr.hbm [resolvable:$true] %s20_s26 }
   0x2   :  { %s22_s28 = sshll.u32 %s849_s27, 4  ;;  %s850_s29 = smov 192   ;;  %s23_s28 = int_to_ptr.vmem [resolvable:$true] %s22_s28 }
   0x3   :  { %s851_s30 = smov 12  }
   0x4   :  { %28 = dma.hbm_to_vmem [thread:$0]  %s21_s26, 3072, %s23_s28, [#allocation3], %s850_s29, %s850_s29, %s851_s30  }
   0x5   :  { %845 = dma.done.wait [#allocation3], 3072  }
   0x6   :  { %846 = vsyncadd [#allocation3], 4294964224  ;;  %v663_v0 = vld [vmem:[#allocation2 + $0xa8] sm:$0xf]  ;;  %v749_v1 = vld [vmem:[#allocation2 + $0xb0] sm:$0xf0] }
   0x7   :  { %v671_v2 = vld [vmem:[#allocation2 + $0xb0] sm:$0xf]  ;;  %v664_v3 = vor.u32 %v749_v1, %v663_v0  ;;  %v750_v4 = vld [vmem:[#allocation2 + $0xb8] sm:$0xf0]  ;;  %v659_v8 = vld [vmem:[#allocation2 + $0x98] sm:$0xf] }
   0x8   :  { %v651_v5 = vld [vmem:[#allocation2 + $0x90] sm:$0xf]  ;;  %v746_v6 = vld [vmem:[#allocation2 + $0x98] sm:$0xf0]  ;;  %v672_v7 = vor.u32 %v750_v4, %v671_v2  ;;  %v747_v9 = vld [vmem:[#allocation2 + $0xa0] sm:$0xf0] }
   0x9   :  { %220 = vmatpush.bf16.msra.mxu1 %v664_v3  ;;  %v652_v10 = vor.u32 %v746_v6, %v651_v5  ;;  %v660_v11 = vor.u32 %v747_v9, %v659_v8  ;;  %v639_v12 = vld [vmem:[#allocation2 + $0x78] sm:$0xf]  ;;  %v743_v13 = vld [vmem:[#allocation2 + $0x80] sm:$0xf0]  ;;  %v647_v14 = vld [vmem:[#allocation2 + $0x80] sm:$0xf] }
   0xa   :  { %258 = vmatpush.bf16.msra.mxu2 %v672_v7  ;;  %v744_v15 = vld [vmem:[#allocation2 + $0x88] sm:$0xf0]  ;;  %v640_v16 = vor.u32 %v743_v13, %v639_v12  ;;  %v627_v18 = vld [vmem:[#allocation2 + $0x60] sm:$0xf]  ;;  %v635_v20 = vld [vmem:[#allocation2 + $0x68] sm:$0xf] }
   0xb   :  { %v648_v17 = vor.u32 %v744_v15, %v647_v14  ;;  %v740_v19 = vld [vmem:[#allocation2 + $0x68] sm:$0xf0]  ;;  %v741_v21 = vld [vmem:[#allocation2 + $0x70] sm:$0xf0]  ;;  %v615_v24 = vld [vmem:[#allocation2 + $0x48] sm:$0xf] }
   0xc   :  { %v628_v22 = vor.u32 %v740_v19, %v627_v18  ;;  %v636_v23 = vor.u32 %v741_v21, %v635_v20  ;;  %v737_v25 = vld [vmem:[#allocation2 + $0x50] sm:$0xf0]  ;;  %v623_v26 = vld [vmem:[#allocation2 + $0x50] sm:$0xf]  ;;  %v738_v27 = vld [vmem:[#allocation2 + $0x58] sm:$0xf0] }
   0xd   :  { %221 = vmatpush.bf16.msra.mxu1 %v652_v10  ;;  %v288_v28 = vld [vmem:[%s985_s3] sm:$0xff]  ;;  %v852_v29 = vmov 0   ;;  %v616_v30 = vor.u32 %v737_v25, %v615_v24  ;;  %v624_v31 = vor.u32 %v738_v27, %v623_v26  ;;  %v603_v32 = vld [vmem:[#allocation2 + $0x30] sm:$0xf]  ;;  %v734_v33 = vld [vmem:[#allocation2 + $0x38] sm:$0xf0] }
   0xe   :  { %259 = vmatpush.bf16.msra.mxu2 %v660_v11  ;;  %793 = vset.pattern.permute.xlu0 %v852_v29  ;;  %v611_v34 = vld [vmem:[#allocation2 + $0x38] sm:$0xf]  ;;  %v735_v35 = vld [vmem:[#allocation2 + $0x40] sm:$0xf0]  ;;  %v604_v36 = vor.u32 %v734_v33, %v603_v32  ;;  %v289_v40 = vld [vmem:[%s985_s3 + $0x8] sm:$0xff]  ;;  %vm492_vm2 = vcmask 261120  }
   0xf   :  { %794 = vset.pattern.permute.xlu1 %v852_v29  ;;  %294 = vperm.xlu0 %793, %v288_v28   ;;  %v612_v37 = vor.u32 %v735_v35, %v611_v34  ;;  %v591_v38 = vld [vmem:[#allocation2 + $0x18] sm:$0xf]  ;;  %v731_v39 = vld [vmem:[#allocation2 + $0x20] sm:$0xf0]  ;;  %v599_v41 = vld [vmem:[#allocation2 + $0x20] sm:$0xf] }
  0x10   :  { %795 = vset.pattern.permute.xlu2 %v852_v29  ;;  %v732_v42 = vld [vmem:[#allocation2 + $0x28] sm:$0xf0]  ;;  %v592_v43 = vor.u32 %v731_v39, %v591_v38  ;;  %v579_v44 = vld [vmem:[#allocation2] sm:$0xf]  ;;  %v587_v47 = vld [vmem:[#allocation2 + $0x8] sm:$0xf] }
  0x11   :  { %222 = vmatpush.bf16.msra.mxu1 %v640_v16  ;;  %v600_v45 = vor.u32 %v732_v42, %v599_v41  ;;  %v728_v46 = vld [vmem:[#allocation2 + $0x8] sm:$0xf0]  ;;  %v325_v48 = vld [vmem:[%s986_s4] sm:$0xff]  ;;  %v729_v49 = vld [vmem:[#allocation2 + $0x10] sm:$0xf0]  ;;  %s853_s24 = smov [#allocation5]  }
  0x12   :  { %260 = vmatpush.bf16.msra.mxu2 %v648_v17  ;;  %v748_v50 = vld [vmem:[#allocation2 + $0xac] sm:$0xf]  ;;  %v665_v51 = vld [vmem:[#allocation2 + $0xb4] sm:$0xf0]  ;;  %331 = vperm.xlu1 %794, %v325_v48   ;;  %v580_v52 = vor.u32 %v728_v46, %v579_v44  ;;  %v588_v53 = vor.u32 %v729_v49, %v587_v47  ;;  %v745_v55 = vld [vmem:[#allocation2 + $0x94] sm:$0xf] }
  0x13   :  { %v668_v54 = vor.u32 %v748_v50, %v665_v51  ;;  %v653_v56 = vld [vmem:[#allocation2 + $0x9c] sm:$0xf0]  ;;  %v742_v59 = vld [vmem:[#allocation2 + $0x7c] sm:$0xf]  ;;  %v641_v60 = vld [vmem:[#allocation2 + $0x84] sm:$0xf0] }
  0x14   :  { %v725_v57 = vld [vmem:[%s982_s0] sm:$0xff]  ;;  %v656_v58 = vor.u32 %v745_v55, %v653_v56  ;;  %v326_v61 = vld [vmem:[%s986_s4 + $0x8] sm:$0xff]  ;;  %v327_v62 = vld [vmem:[%s986_s4 + $0x10] sm:$0xff]  ;;  %v644_v63 = vor.u32 %v742_v59, %v641_v60  ;;  %s854_s26 = smov 64   ;;  %s855_s27 = smov 4  }
  0x15   :  { %223 = vmatpush.bf16.msra.mxu1 %v628_v22  ;;  %v739_v0 = vld [vmem:[#allocation2 + $0x64] sm:$0xf]  ;;  %v629_v1 = vld [vmem:[#allocation2 + $0x6c] sm:$0xf0]  ;;  %v328_v3 = vld [vmem:[%s986_s4 + $0x18] sm:$0xff]  ;;  %s554_s4 = sshll.u32 %s853_s24, 4  ;;  %s555_s4 = int_to_ptr.vmem [resolvable:$true] %s554_s4 }
  0x16   :  { %261 = vmatpush.bf16.msra.mxu2 %v636_v23  ;;  %v632_v2 = vor.u32 %v739_v0, %v629_v1  ;;  %v736_v4 = vld [vmem:[#allocation2 + $0x4c] sm:$0xf]  ;;  %v617_v5 = vld [vmem:[#allocation2 + $0x54] sm:$0xf0]  ;;  %v733_v7 = vld [vmem:[#allocation2 + $0x34] sm:$0xf] }
  0x17   :  { %299 = vperm.xlu0 %793, %v289_v40   ;;  %v620_v6 = vor.u32 %v736_v4, %v617_v5  ;;  %v605_v8 = vld [vmem:[#allocation2 + $0x3c] sm:$0xf0]  ;;  %v726_v9 = vld [vmem:[%s982_s0 + $0x8] sm:$0xff]  ;;  %v730_v11 = vld [vmem:[#allocation2 + $0x1c] sm:$0xf] }
  0x18   :  { %v608_v10 = vor.u32 %v733_v7, %v605_v8  ;;  %v593_v12 = vld [vmem:[#allocation2 + $0x24] sm:$0xf0]  ;;  %v290_v13 = vld [vmem:[%s985_s3 + $0x10] sm:$0xff]  ;;  %v727_v15 = vld [vmem:[#allocation2 + $0x4] sm:$0xf] }
  0x19   :  { %224 = vmatpush.bf16.msra.mxu1 %v616_v30  ;;  %304 = vperm.xlu2 %795, %v290_v13   ;;  %v596_v14 = vor.u32 %v730_v11, %v593_v12  ;;  %v581_v16 = vld [vmem:[#allocation2 + $0xc] sm:$0xf0]  ;;  %v291_v18 = vld [vmem:[%s985_s3 + $0x18] sm:$0xff]  ;;  %v756_v21 = vld [vmem:[%s987_s5 + $0x28] sm:$0xff] }
  0x1a   :  { %262 = vmatpush.bf16.msra.mxu2 %v624_v31  ;;  %336 = vperm.xlu1 %794, %v326_v61   ;;  %v584_v17 = vor.u32 %v727_v15, %v581_v16  ;;  %v758_v19 = vld [vmem:[%s987_s5 + $0x38] sm:$0xff]  ;;  %v757_v20 = vld [vmem:[%s987_s5 + $0x30] sm:$0xff]  ;;  %v755_v23 = vld [vmem:[%s987_s5 + $0x20] sm:$0xff]  ;;  %v281_v31 = vlaneseq }
  0x1b   :  { %443 = vmatpush.bf16.msra.mxu3 %v758_v19  ;;  %v754_v24 = vld [vmem:[%s987_s5 + $0x18] sm:$0xff]  ;;  %v753_v26 = vld [vmem:[%s987_s5 + $0x10] sm:$0xff]  ;;  %v752_v28 = vld [vmem:[%s987_s5 + $0x8] sm:$0xff] }
  0x1c   :  { %v751_v30 = vld [vmem:[%s987_s5] sm:$0xff]  ;;  %v282_v33 = vshrl.u32 %v281_v31, 7 }
  0x1d   :  { %225 = vmatpush.bf16.msra.mxu1 %v604_v36 }
  0x1e   :  { %263 = vmatpush.bf16.msra.mxu2 %v612_v37  ;;  %vm283_vm0 = vcmp.lt.s32.totalorder %v282_v33, 1  ;;  %vm320_vm1 = vcmp.lt.s32.totalorder %v282_v33, 7 }
  0x1f   :  { %341 = vperm.xlu0 %793, %v327_v62   ;;  %444 = vmatpush.bf16.msra.mxu3 %v757_v20 }
  0x21   :  { %226 = vmatpush.bf16.msra.mxu1 %v592_v43  ;;  %309 = vperm.xlu2 %795, %v291_v18  }
  0x22   :  { %264 = vmatpush.bf16.msra.mxu2 %v600_v45  ;;  %346 = vperm.xlu1 %794, %v328_v3  }
  0x23   :  { %445 = vmatpush.bf16.msra.mxu3 %v756_v21 }
  0x25   :  { %227 = vmatpush.bf16.msra.mxu1 %v580_v52 }
  0x26   :  { %265 = vmatpush.bf16.msra.mxu2 %v588_v53  ;;  %v796_v53 = vld [vmem:[%s984_s2] ss:$0 sm:$0xff] }
  0x27   :  { %446 = vmatpush.bf16.msra.mxu3 %v755_v23 }
  0x28   :  { %228 = vmatmul.bf16.vlgmr.msra.gmra.mxu1 %v725_v57 }
  0x29   :  { %239 = vmatpush.bf16.msrb.mxu1 %v668_v54  ;;  %266 = vmatmul.bf16.vlgmr.msra.gmra.mxu2 %v725_v57 }
  0x2b   :  { %447 = vmatpush.bf16.msra.mxu3 %v754_v24 }
  0x2d   :  { %240 = vmatpush.bf16.msrb.mxu1 %v656_v58 }
  0x2f   :  { %448 = vmatpush.bf16.msra.mxu3 %v753_v26 }
  0x31   :  { %241 = vmatpush.bf16.msrb.mxu1 %v644_v63 }
  0x33   :  { %449 = vmatpush.bf16.msra.mxu3 %v752_v28 }
  0x35   :  { %242 = vmatpush.bf16.msrb.mxu1 %v632_v2 }
  0x37   :  { %450 = vmatpush.bf16.msra.mxu3 %v751_v30 }
  0x38   :  { %233 = vmatmul.bf16.gmra.mxu1 %v726_v9 }
  0x39   :  { %243 = vmatpush.bf16.msrb.mxu1 %v620_v6  ;;  %271 = vmatmul.bf16.gmra.mxu2 %v726_v9 }
  0x3d   :  { %244 = vmatpush.bf16.msrb.mxu1 %v608_v10 }
  0x41   :  { %245 = vmatpush.bf16.msrb.mxu1 %v596_v14 }
  0x45   :  { %246 = vmatpush.bf16.msrb.mxu1 %v584_v17 }
  0x48   :  { %247 = vmatmul.bf16.vlgmr.msrb.gmra.mxu1 %v725_v57 }
  0x58   :  { %252 = vmatmul.bf16.gmra.mxu1 %v726_v9 }
  0x73   :  { %v305_v63 = vpop.permute.xlu2 %304 }
  0x7b   :  { %v310_v15 = vpop.permute.xlu2 %309 }
  0x81   :  { %v295_v37 = vpop.permute.xlu0 %294 }
  0x84   :  { %v332_v40 = vpop.permute.xlu1 %331 }
  0x89   :  { %v300_v50 = vpop.permute.xlu0 %299 }
  0x8c   :  { %v337_v54 = vpop.permute.xlu1 %336 }
  0x91   :  { %v342_v12 = vpop.permute.xlu0 %341 }
  0x94   :  { %v347_v18 = vpop.permute.xlu1 %346 }
  0xa5   :  { %v229_v22 = vpop.f32.mrf.mxu1 }
  0xa6   :  { %v277_v36 = vrot.slane %v229_v22, 7 }
  0xac   :  { %v947_v27 = vpop.f32.mrf.mxu2 }
  0xad   :  { %v231_v25 = vpop.f32.mrf.mxu1  ;;  %v316_v38 = vrot.slane %v947_v27, 1 }
  0xae   :  { %v278_v44 = vrot.slane %v231_v25, 7 }
  0xb0   :  { %v286_v51 = vsel %vm283_vm0, %v277_v36, %v278_v44 }
  0xb1   :  { %v313_v56 = vmul.f32 %v300_v50, %v286_v51 }
  0xb4   :  { %v269_v32 = vpop.f32.mrf.mxu2 }
  0xb5   :  { %v234_v29 = vpop.f32.mrf.mxu1  ;;  %v317_v39 = vrot.slane %v269_v32, 1 }
  0xb6   :  { %v279_v57 = vrot.slane %v234_v29, 7 }
  0xb7   :  { %v323_v45 = vsel %vm320_vm1, %v316_v38, %v317_v39 }
  0xb8   :  { %v349_v49 = vmul.f32 %v332_v40, %v323_v45  ;;  %v285_v1 = vsel %vm283_vm0, %v278_v44, %v279_v57  ;;  %v761_v40 = vld [vmem:[%s988_s6 + $0x10] sm:$0xff] }
  0xb9   :  { %v314_v5 = vmul.f32 %v305_v63, %v285_v1 }
  0xbc   :  { %v272_v42 = vpop.f32.mrf.mxu2 }
  0xbd   :  { %v236_v34 = vpop.f32.mrf.mxu1  ;;  %v318_v48 = vrot.slane %v272_v42, 1 }
  0xbe   :  { %v280_v35 = vrot.slane %v236_v34, 7 }
  0xbf   :  { %v322_v55 = vsel %vm320_vm1, %v317_v39, %v318_v48  ;;  %v760_v39 = vld [vmem:[%s988_s6 + $0x8] sm:$0xff] }
  0xc0   :  { %v287_v41 = vsel %vm283_vm0, %v280_v35, %v277_v36  ;;  %v350_v59 = vmul.f32 %v337_v54, %v322_v55  ;;  %v284_v16 = vsel %vm283_vm0, %v279_v57, %v280_v35 }
  0xc1   :  { %v312_v43 = vmul.f32 %v295_v37, %v287_v41  ;;  %v315_v20 = vmul.f32 %v310_v15, %v284_v16  ;;  %v762_v41 = vld [vmem:[%s988_s6 + $0x18] sm:$0xff] }
  0xc4   :  { %v274_v60 = vpop.f32.mrf.mxu2 }
  0xc5   :  { %v248_v46 = vpop.f32.mrf.mxu1  ;;  %v319_v2 = vrot.slane %v274_v60, 1 }
  0xc6   :  { %v353_v47 = vadd.f32 %v312_v43, %v248_v46 }
  0xc7   :  { %v321_v7 = vsel %vm320_vm1, %v318_v48, %v319_v2  ;;  %v324_v19 = vsel %vm320_vm1, %v319_v2, %v316_v38  ;;  %v759_v38 = vld [vmem:[%s988_s6] sm:$0xff]  ;;  %s556_s6 = sshll.u32 %s989_s7, 4  ;;  %s557_s6 = int_to_ptr.hbm [resolvable:$true] %s556_s6 }
  0xc8   :  { %v357_v52 = vadd.f32 %v353_v47, %v349_v49  ;;  %v351_v13 = vmul.f32 %v342_v12, %v321_v7  ;;  %v352_v22 = vmul.f32 %v347_v18, %v324_v19 }
  0xca   :  { %v365_v62 = vadd.f32 %v796_v53, %v357_v52 }
  0xcc   :  { %v369_v4 = vmax.f32 %v365_v62, 0.0 }
  0xcd   :  { %v250_v58 = vpop.f32.mrf.mxu1 }
  0xce   :  { %v354_v61 = vadd.f32 %v313_v56, %v250_v58  ;;  %v373_v10 = vmin.f32 %v369_v4, 6.0 }
  0xd0   :  { %v358_v0 = vadd.f32 %v354_v61, %v350_v59 }
  0xd2   :  { %v366_v3 = vadd.f32 %v796_v53, %v358_v0 }
  0xd4   :  { %v370_v6 = vmax.f32 %v366_v3, 0.0 }
  0xd5   :  { %v253_v8 = vpop.f32.mrf.mxu1 }
  0xd6   :  { %v355_v9 = vadd.f32 %v314_v5, %v253_v8  ;;  %v374_v11 = vmin.f32 %v370_v6, 6.0 }
  0xd8   :  { %v377_v14 = vpack.c.bf16 %v374_v11, %v373_v10  ;;  %v359_v17 = vadd.f32 %v355_v9, %v351_v13 }
  0xda   :  { %451 = vmatmul.bf16.vlgmr.msra.gmra.mxu3 %v377_v14  ;;  %v367_v24 = vadd.f32 %v796_v53, %v359_v17 }
  0xdc   :  { %v371_v27 = vmax.f32 %v367_v24, 0.0 }
  0xdd   :  { %v255_v21 = vpop.f32.mrf.mxu1 }
  0xde   :  { %v356_v23 = vadd.f32 %v315_v20, %v255_v21  ;;  %v375_v29 = vmin.f32 %v371_v27, 6.0 }
  0xe0   :  { %v360_v25 = vadd.f32 %v356_v23, %v352_v22 }
  0xe2   :  { %v368_v26 = vadd.f32 %v796_v53, %v360_v25 }
  0xe4   :  { %v372_v28 = vmax.f32 %v368_v26, 0.0 }
  0xe6   :  { %v376_v30 = vmin.f32 %v372_v28, 6.0 }
  0xe8   :  { %v378_v31 = vpack.c.bf16 %v376_v30, %v375_v29 }
  0xea   :  { %456 = vmatmul.bf16.gmra.mxu3 %v378_v31 }
 0x15d   :  { %v452_v32 = vpop.f32.mrf.mxu3 }
 0x165   :  { %v454_v34 = vpop.f32.mrf.mxu3 }
 0x166   :  { %v470_v33 = vpack.c.bf16 %v454_v34, %v452_v32 }
 0x16d   :  { %v457_v35 = vpop.f32.mrf.mxu3 }
 0x175   :  { %v459_v36 = vpop.f32.mrf.mxu3 }
 0x176   :  { %v471_v37 = vpack.c.bf16 %v459_v36, %v457_v35 }
 0x178   :  { %511 = vmatpush.bf16.msra.mxu0 %v471_v37 }
 0x17c   :  { %512 = vmatpush.bf16.msra.mxu0 %v470_v33 }
 0x17f   :  { %721 = vmatmul.msk.bf16.vlgmr.msra.gmra.mxu0 %vm492_vm2, %v759_v38 }
 0x18f   :  { %722 = vmatmul.msk.bf16.gmra.mxu0 %vm492_vm2, %v760_v39 }
 0x19f   :  { %723 = vmatmul.msk.bf16.gmra.mxu0 %vm492_vm2, %v761_v40 }
 0x1af   :  { %724 = vmatmul.msk.bf16.gmra.mxu0 %vm492_vm2, %v762_v41 }
 0x1fc   :  { %v514_v42 = vpop.f32.mrf.mxu0 }
 0x204   :  { %v516_v43 = vpop.f32.mrf.mxu0 }
 0x205   :  { %v766_v44 = vpack.c.bf16 %v516_v43, %v514_v42 }
 0x207   :  { %767 = vst [vmem:[#allocation5] sm:$0xff] %v766_v44  }
 0x20c   :  { %v519_v45 = vpop.f32.mrf.mxu0 }
 0x214   :  { %v521_v46 = vpop.f32.mrf.mxu0 }
 0x215   :  { %v771_v47 = vpack.c.bf16 %v521_v46, %v519_v45 }
 0x217   :  { %783 = vst [vmem:[#allocation5 + $0x8] sm:$0xff] %v771_v47  }
 0x21c   :  { %v524_v48 = vpop.f32.mrf.mxu0 }
 0x224   :  { %v526_v49 = vpop.f32.mrf.mxu0 }
 0x225   :  { %v776_v50 = vpack.c.bf16 %v526_v49, %v524_v48 }
 0x227   :  { %784 = vst [vmem:[#allocation5 + $0x10] sm:$0xff] %v776_v50  }
 0x22c   :  { %v529_v51 = vpop.f32.mrf.mxu0 }
 0x234   :  { %v531_v52 = vpop.f32.mrf.mxu0 }
 0x235   :  { %v781_v53 = vpack.c.bf16 %v531_v52, %v529_v51 }
 0x237   :  { %785 = vst [vmem:[#allocation5 + $0x18] sm:$0xff] %v781_v53  }
 0x238   :  { %562 = dma.vmem_to_hbm [thread:$0]  %s555_s4, 512, %s557_s6, [#allocation4], %s854_s26, %s854_s26, %s855_s27  }
 0x239   :  { %847 = dma.done.wait [#allocation4], 512  }
 0x23a   :  { %848 = vsyncadd [#allocation4], 4294966784 }
 0x23b   :  { %567 = vsyncpa [#allocation3], 1 }
 0x23c   :  { %568 = vsyncpa [#allocation4], 1 }

</bundles_post_ra>
